<compile_context>
chip_gen: v6e
topology: v6e:2x2x1
jax: 0.10.0
libtpu: 0.0.40
codegen_flags: <defaults>
</compile_context>

<pallas_src>
import jax
import jax.numpy as jnp
from jax.experimental import pallas as pl
from jax.experimental.pallas import tpu as pltpu


def fuse_model_params(weights, biases):
    """One-time parameter prep (== ModelsWrapper.__init__ time).

    Stacks the M per-model (H, O) weight matrices along the lane axis into a
    single (H, M*O) f32 RHS and keeps the biases as (M, 1, O) f32.
    """
    M, H, O = weights.shape
    w_fused = jnp.transpose(weights.astype(jnp.float32), (1, 0, 2)).reshape(H, M * O)
    b = biases.astype(jnp.float32).reshape(M, 1, O)
    return w_fused, b


@jax.jit
def _forward_impl(batches_x, batches_y, w_fused, biases):
    """Pallas forward: returns the stacked per-model losses, shape (M,) f32."""
    M, B, H = batches_x.shape
    _, _, O = batches_y.shape
    assert w_fused.shape == (H, M * O)
    assert biases.shape == (M, 1, O)

    inv_n = 1.0 / float(B * O)  # mean over each model's (B, O) elements

    def kernel(x_ref, y_ref, w_ref, b_ref, loss_ref):
        # x_ref: (M*B, H) f32    w_ref: (H, M*O) f32
        # y_ref: (M, B, O) f32   b_ref: (M, 1, O) f32
        # loss_ref: (M,) f32 in SMEM
        # Single fused MXU pass for all M wrapped models (the ModelsWrapper
        # per-model loop is reduced to static diagonal-block slices).
        pred_all = jnp.dot(
            x_ref[...], w_ref[...], preferred_element_type=jnp.float32
        )  # (M*B, M*O) f32
        for m in range(M):
            pred = pred_all[m * B:(m + 1) * B, m * O:(m + 1) * O] + b_ref[m]
            diff = pred - y_ref[m]
            loss_ref[m] = jnp.sum(diff * diff) * inv_n

    # Contiguous leading-dim merge -> free reshape (no data movement).
    x2 = batches_x.reshape(M * B, H)

    all_loss = pl.pallas_call(
        kernel,
        out_shape=jax.ShapeDtypeStruct((M,), jnp.float32),
        # No grid: single invocation, whole arrays resident in VMEM, nothing
        # to pipeline (no double-buffering / prologue DMA machinery).
        in_specs=[
            pl.BlockSpec(memory_space=pltpu.VMEM),  # x  (M*B, H)
            pl.BlockSpec(memory_space=pltpu.VMEM),  # y  (M, B, O)
            pl.BlockSpec(memory_space=pltpu.VMEM),  # W  (H, M*O)
            pl.BlockSpec(memory_space=pltpu.VMEM),  # b  (M, 1, O)
        ],
        # (M,) loss vector in SMEM, written back to HBM once.
        out_specs=pl.BlockSpec(memory_space=pltpu.SMEM),
    )(x2, batches_y, w_fused, biases)
    return all_loss


def models_wrapper_forward(batches_x, batches_y, w_fused, biases, names):
    """JAX/Pallas equivalent of ModelsWrapper.forward(batches).

    Returns (all_loss, all_metric): all_loss is the (M,) f32 device array
    (== torch.stack(all_loss)); all_metric maps "<name> mse" -> scalar loss,
    built from a single host fetch of the loss vector.
    """
    all_loss = _forward_impl(batches_x, batches_y, w_fused, biases)
    loss_host = jax.device_get(all_loss)  # one (M,) transfer, not M slices
    all_metric = {}
    for i, name in enumerate(names):
        all_metric[name + " mse"] = float(loss_host[i])
    return all_loss, all_metric


def _reference_forward(batches_x, batches_y, weights, biases):
    # Pure-JAX reference with the same f32 semantics as the kernel.
    pred = jnp.einsum(
        "mbh,mho->mbo", batches_x, weights, preferred_element_type=jnp.float32
    ) + biases
    diff = pred - batches_y
    return jnp.mean(diff * diff, axis=(1, 2))


if __name__ == "__main__":
    # Small shapes: 3 wrapped task models, batch=8, hidden=32, out=16.
    M, B, H, O = 3, 8, 32, 16
    names = ["PropertyPrediction", "InteractionPrediction", "RetroSynthesis"]

    key = jax.random.PRNGKey(0)
    kx, ky, kw, kb = jax.random.split(key, 4)
    batches_x = jax.random.normal(kx, (M, B, H), dtype=jnp.float32)
    batches_y = jax.random.normal(ky, (M, B, O), dtype=jnp.float32)
    # Deterministic per-model parameters (synthetic init, no checkpoint load).
    weights = jax.random.normal(kw, (M, H, O), dtype=jnp.float32) * 0.1
    biases = jax.random.normal(kb, (M, 1, O), dtype=jnp.float32) * 0.1

    # One-time parameter prep (outside the per-forward path).
    w_fused, b_fused = fuse_model_params(weights, biases)

    all_loss, all_metric = models_wrapper_forward(
        batches_x, batches_y, w_fused, b_fused, names
    )
    all_loss = jax.block_until_ready(all_loss)

    ref = _reference_forward(batches_x, batches_y, weights, biases)
    assert all_loss.shape == (M,)
    assert jnp.allclose(all_loss, ref, rtol=1e-4, atol=1e-5), (all_loss, ref)
    assert set(all_metric.keys()) == {n + " mse" for n in names}

    print("KERNEL_OK")
</pallas_src>

<mosaic_0001>
module attributes {stable_mosaic.version = 11 : i64} {
  func.func @kernel(%arg0: memref<24x32xf32, #tpu.memory_space<vmem>>, %arg1: memref<3x8x16xf32, #tpu.memory_space<vmem>>, %arg2: memref<32x48xf32, #tpu.memory_space<vmem>>, %arg3: memref<3x1x16xf32, #tpu.memory_space<vmem>>, %arg4: memref<3xf32, #tpu.memory_space<smem>>) attributes {dimension_semantics = [], scalar_prefetch = 0 : i64, scratch_operands = 0 : i64, tpu.core_type = #tpu.core_type<tc>} {
    %c0 = arith.constant 0 : index
    %c0_0 = arith.constant 0 : index
    %0 = vector.load %arg0[%c0, %c0_0] : memref<24x32xf32, #tpu.memory_space<vmem>>, vector<24x32xf32>
    %c0_1 = arith.constant 0 : index
    %c0_2 = arith.constant 0 : index
    %1 = vector.load %arg2[%c0_1, %c0_2] : memref<32x48xf32, #tpu.memory_space<vmem>>, vector<32x48xf32>
    %cst = arith.constant dense<0.000000e+00> : vector<24x48xf32>
    %2 = tpu.matmul %0, %1, %cst {dimension_numbers = #tpu.dot_dimension_numbers<[1], [0], [0], [1], [0, 0, 1, 1], [], []>} : vector<24x32xf32>, vector<32x48xf32>, vector<24x48xf32> -> vector<24x48xf32>
    %3 = vector.extract_strided_slice %2 {offsets = [0, 0], sizes = [8, 16], strides = [1, 1]} : vector<24x48xf32> to vector<8x16xf32>
    %c0_3 = arith.constant 0 : index
    %c0_4 = arith.constant 0 : index
    %c0_5 = arith.constant 0 : index
    %4 = vector.load %arg3[%c0_3, %c0_4, %c0_5] : memref<3x1x16xf32, #tpu.memory_space<vmem>>, vector<1x1x16xf32>
    %5 = vector.shape_cast %4 : vector<1x1x16xf32> to vector<1x16xf32>
    %6 = vector.broadcast %5 : vector<1x16xf32> to vector<8x16xf32>
    %7 = arith.addf %3, %6 : vector<8x16xf32>
    %c0_6 = arith.constant 0 : index
    %c0_7 = arith.constant 0 : index
    %c0_8 = arith.constant 0 : index
    %8 = vector.load %arg1[%c0_6, %c0_7, %c0_8] : memref<3x8x16xf32, #tpu.memory_space<vmem>>, vector<1x8x16xf32>
    %9 = vector.shape_cast %8 : vector<1x8x16xf32> to vector<8x16xf32>
    %10 = arith.subf %7, %9 : vector<8x16xf32>
    %11 = arith.mulf %10, %10 : vector<8x16xf32>
    %12 = vector.shape_cast %11 : vector<8x16xf32> to vector<1x8x16xf32>
    %cst_9 = arith.constant dense<0.000000e+00> : vector<1xf32>
    %13 = vector.multi_reduction <add>, %12, %cst_9 [1, 2] : vector<1x8x16xf32> to vector<1xf32>
    %14 = vector.shape_cast %13 : vector<1xf32> to vector<1x1x1xf32>
    %15 = vector.extract %14[0, 0, 0] : f32 from vector<1x1x1xf32>
    %cst_10 = arith.constant 7.812500e-03 : f32
    %16 = arith.mulf %15, %cst_10 : f32
    %c0_11 = arith.constant 0 : index
    %17 = memref.load %arg4[%c0_11] : memref<3xf32, #tpu.memory_space<smem>>
    memref.store %16, %arg4[%c0_11] : memref<3xf32, #tpu.memory_space<smem>>
    %18 = vector.extract_strided_slice %2 {offsets = [8, 16], sizes = [8, 16], strides = [1, 1]} : vector<24x48xf32> to vector<8x16xf32>
    %c1 = arith.constant 1 : index
    %c0_12 = arith.constant 0 : index
    %c0_13 = arith.constant 0 : index
    %19 = vector.load %arg3[%c1, %c0_12, %c0_13] : memref<3x1x16xf32, #tpu.memory_space<vmem>>, vector<1x1x16xf32>
    %20 = vector.shape_cast %19 : vector<1x1x16xf32> to vector<1x16xf32>
    %21 = vector.broadcast %20 : vector<1x16xf32> to vector<8x16xf32>
    %22 = arith.addf %18, %21 : vector<8x16xf32>
    %c1_14 = arith.constant 1 : index
    %c0_15 = arith.constant 0 : index
    %c0_16 = arith.constant 0 : index
    %23 = vector.load %arg1[%c1_14, %c0_15, %c0_16] : memref<3x8x16xf32, #tpu.memory_space<vmem>>, vector<1x8x16xf32>
    %24 = vector.shape_cast %23 : vector<1x8x16xf32> to vector<8x16xf32>
    %25 = arith.subf %22, %24 : vector<8x16xf32>
    %26 = arith.mulf %25, %25 : vector<8x16xf32>
    %27 = vector.shape_cast %26 : vector<8x16xf32> to vector<1x8x16xf32>
    %cst_17 = arith.constant dense<0.000000e+00> : vector<1xf32>
    %28 = vector.multi_reduction <add>, %27, %cst_17 [1, 2] : vector<1x8x16xf32> to vector<1xf32>
    %29 = vector.shape_cast %28 : vector<1xf32> to vector<1x1x1xf32>
    %30 = vector.extract %29[0, 0, 0] : f32 from vector<1x1x1xf32>
    %cst_18 = arith.constant 7.812500e-03 : f32
    %31 = arith.mulf %30, %cst_18 : f32
    %c1_19 = arith.constant 1 : index
    %32 = memref.load %arg4[%c1_19] : memref<3xf32, #tpu.memory_space<smem>>
    memref.store %31, %arg4[%c1_19] : memref<3xf32, #tpu.memory_space<smem>>
    %33 = vector.extract_strided_slice %2 {offsets = [16, 32], sizes = [8, 16], strides = [1, 1]} : vector<24x48xf32> to vector<8x16xf32>
    %c2 = arith.constant 2 : index
    %c0_20 = arith.constant 0 : index
    %c0_21 = arith.constant 0 : index
    %34 = vector.load %arg3[%c2, %c0_20, %c0_21] : memref<3x1x16xf32, #tpu.memory_space<vmem>>, vector<1x1x16xf32>
    %35 = vector.shape_cast %34 : vector<1x1x16xf32> to vector<1x16xf32>
    %36 = vector.broadcast %35 : vector<1x16xf32> to vector<8x16xf32>
    %37 = arith.addf %33, %36 : vector<8x16xf32>
    %c2_22 = arith.constant 2 : index
    %c0_23 = arith.constant 0 : index
    %c0_24 = arith.constant 0 : index
    %38 = vector.load %arg1[%c2_22, %c0_23, %c0_24] : memref<3x8x16xf32, #tpu.memory_space<vmem>>, vector<1x8x16xf32>
    %39 = vector.shape_cast %38 : vector<1x8x16xf32> to vector<8x16xf32>
    %40 = arith.subf %37, %39 : vector<8x16xf32>
    %41 = arith.mulf %40, %40 : vector<8x16xf32>
    %42 = vector.shape_cast %41 : vector<8x16xf32> to vector<1x8x16xf32>
    %cst_25 = arith.constant dense<0.000000e+00> : vector<1xf32>
    %43 = vector.multi_reduction <add>, %42, %cst_25 [1, 2] : vector<1x8x16xf32> to vector<1xf32>
    %44 = vector.shape_cast %43 : vector<1xf32> to vector<1x1x1xf32>
    %45 = vector.extract %44[0, 0, 0] : f32 from vector<1x1x1xf32>
    %cst_26 = arith.constant 7.812500e-03 : f32
    %46 = arith.mulf %45, %cst_26 : f32
    %c2_27 = arith.constant 2 : index
    %47 = memref.load %arg4[%c2_27] : memref<3xf32, #tpu.memory_space<smem>>
    memref.store %46, %arg4[%c2_27] : memref<3xf32, #tpu.memory_space<smem>>
    return
  }
}

</mosaic_0001>

<bundles_post_ra>
// kernel: _forward_impl.1
= control target key start
LH: loop header
LB: loop body
LE: loop exit
PB: predicated region body
PF: predicated region fallthrough
CT: control target
= control target key end

     0   :  { %9 = vsyncpa [#allocation3], 0  ;;  %s464_s0 = inlined_call_operand.hbm [shape: f32[24,32], index: 0, kind: input, shape index: {}]   ;;  %s465_s1 = inlined_call_operand.hbm [shape: f32[3,8,16], index: 1, kind: input, shape index: {}]   ;;  %s466_s2 = inlined_call_operand.hbm [shape: f32[32,48], index: 2, kind: input, shape index: {}]   ;;  %s467_s3 = inlined_call_operand.vmem [shape: f32[3,1,16], index: 3, kind: input, shape index: {}]   ;;  %s468_s4 = inlined_call_operand.hbm [shape: f32[3], index: 4, kind: output, shape index: {}]  }
   0x1   :  { %10 = vsyncpa [#allocation6], 0 }
   0x2   :  { %11 = vsyncpa [#allocation4], 0  ;;  %s400_s15 = smov [#allocation5]   ;;  %s401_s17 = smov [#allocation2]  }
   0x3   :  { %s29_s16 = sshll.u32 %s400_s15, 4  ;;  %s17_s18 = sshll.u32 %s401_s17, 4  ;;  %s30_s16 = int_to_ptr.vmem [resolvable:$true] %s29_s16  ;;  %s18_s18 = int_to_ptr.vmem [resolvable:$true] %s17_s18 }
   0x4   :  { %s334_s19 = scalar_lea.vmem %s30_s16, 384  ;;  %p339_p1 = scmp.lt.s32.totalorder %s30_s16, %s30_s16 }
   0x5   :  { %p335_p0 = scmp.ne.s32.totalorder %s30_s16, %s334_s19  ;;  %p340_p2 = scmp.lt.s32.totalorder %s334_s19, %s334_s19 }
   0x7   :  { %p341_p3 = por %p340_p2, %p339_p1 }
   0x9   :  { %p342_p4 = pnand %p341_p3, %p335_p0 }
   0xb   :  { %345 = shalt.err (!%p342_p4)
}
   0xc   :  { %s402_s20 = smov 128   ;;  %s403_s21 = smov 8  }
   0xd   :  { %35 = dma.hbm_to_vmem [thread:$0]  %s465_s1, 384, %s30_s16, [#allocation6], %s402_s20, %s402_s20, %s403_s21  }
   0xe   :  { %s354_s24 = scalar_lea.vmem %s18_s18, 384  ;;  %p359_p6 = scmp.lt.s32.totalorder %s18_s18, %s18_s18 }
   0xf   :  { %p355_p5 = scmp.ne.s32.totalorder %s18_s18, %s354_s24  ;;  %p360_p7 = scmp.lt.s32.totalorder %s354_s24, %s354_s24 }
  0x11   :  { %p361_p8 = por %p360_p7, %p359_p6 }
  0x13   :  { %p362_p9 = pnand %p361_p8, %p355_p5 }
  0x15   :  { %365 = shalt.err (!%p362_p9)
}
  0x16   :  { %23 = dma.hbm_to_vmem [thread:$0]  %s464_s0, 384, %s18_s18, [#allocation3], %s402_s20, %s402_s20, %s403_s21  }
  0x17   :  { %s404_s27 = smov [#allocation7]  }
  0x18   :  { %s41_s28 = sshll.u32 %s404_s27, 4  ;;  %s42_s28 = int_to_ptr.vmem [resolvable:$true] %s41_s28 }
  0x19   :  { %s374_s29 = scalar_lea.vmem %s42_s28, 512  ;;  %p379_p11 = scmp.lt.s32.totalorder %s42_s28, %s42_s28 }
  0x1a   :  { %p375_p10 = scmp.ne.s32.totalorder %s42_s28, %s374_s29  ;;  %p380_p12 = scmp.lt.s32.totalorder %s374_s29, %s374_s29 }
  0x1c   :  { %p381_p13 = por %p380_p12, %p379_p11 }
  0x1e   :  { %p382_p0 = pnand %p381_p13, %p375_p10 }
  0x20   :  { %385 = shalt.err (!%p382_p0)
}
  0x21   :  { %47 = dma.hbm_to_vmem [thread:$0]  %s466_s2, 512, %s42_s28, [#allocation6], %s402_s20, %s402_s20, %s403_s21  }
  0x22   :  { %394 = dma.done.wait [#allocation3], 384  }
  0x23   :  { %395 = vsyncadd [#allocation3], 4294966912 }
  0x24   :  { %396 = dma.done.wait [#allocation6], 896  }
  0x25   :  { %397 = vsyncadd [#allocation6], 4294966400  ;;  %v405_v0 = vmov 0.0   ;;  %vm406_vm0 = vmmov 0   ;;  %v65_v1 = vld [vmem:[#allocation7 + $0x18] sm:$0xff]  ;;  %v64_v2 = vld [vmem:[#allocation7 + $0x10] sm:$0xff] }
  0x26   :  { %300 = vmatprep.subr.mxu1 %v405_v0  ;;  %294 = vmatprep.mubr.msk.f32.mxu1 %vm406_vm0, %v405_v0  ;;  %v63_v3 = vld [vmem:[#allocation7 + $0x8] sm:$0xff]  ;;  %v273_v4 = vld [vmem:[%s467_s3 + $0x1] ss:$0 sm:$0xff]  ;;  %s407_s5 = smov 16   ;;  %v62_v6 = vld [vmem:[#allocation7] sm:$0xff]  ;;  %vm66_vm1 = vcmask 261120  }
  0x27   :  { %283 = vmatprep.subr.mxu0 %v405_v0  ;;  %291 = vmatprep.mubr.msk.f32.mxu0 %vm406_vm0, %v405_v0  ;;  %v193_v5 = vld [vmem:[#allocation5 + $0x8] sm:$0xff]  ;;  %v60_v8 = vld [vmem:[#allocation2 + $0x8] sm:$0xff]  ;;  %s408_s8 = smov 32   ;;  %v61_v10 = vld [vmem:[#allocation2 + $0x10] sm:$0xff]  ;;  %s409_s9 = smov 112   ;;  %vm167_vm2 = vcmask 130048  }
  0x28   :  { %304 = vmatpush3.msra.mxu1 %v65_v1  ;;  %284 = vmatpush3.msra.mxu0 %v65_v1  ;;  %v275_v7 = vld [vmem:[%s467_s3 + $0x2] ss:$0 sm:$0xff]  ;;  %v229_v9 = vld [vmem:[#allocation5 + $0x10] sm:$0xff]  ;;  %s410_s10 = smov 96   ;;  %v271_v28 = vld [vmem:[%s467_s3] ss:$0 sm:$0xff] }
  0x29   :  { %301 = vmatprep.subr.mxu1 %v405_v0  ;;  %285 = vmatprep.subr.mxu0 %v405_v0  ;;  %v59_v11 = vld [vmem:[#allocation2] sm:$0xff]  ;;  %v164_v30 = vld [vmem:[#allocation5] sm:$0xff]  ;;  %s411_s18 = smov [#allocation8]  }
  0x2a   :  { %305 = vmatpush3.msra.mxu1 %v64_v2  ;;  %188 = vrot.lane.b32.xlu0 %v273_v4, %s407_s5 }
  0x2b   :  { %302 = vmatprep.subr.mxu1 %v405_v0  ;;  %195 = vrot.lane.b32.xlu1 %v193_v5, %s407_s5 }
  0x2c   :  { %306 = vmatpush3.msra.mxu1 %v63_v3  ;;  %286 = vmatpush3.msra.mxu0 %v64_v2 }
  0x2d   :  { %303 = vmatprep.subr.mxu1 %v405_v0  ;;  %287 = vmatprep.subr.mxu0 %v405_v0 }
  0x2e   :  { %307 = vmatpush3.msra.mxu1 %v62_v6  ;;  %224 = vrot.lane.b32.xlu0 %v275_v7, %s408_s8 }
  0x2f   :  { %295 = vmatmul.mubr.msk.f32.vlgmr.msra.gmra.mxu1 %vm66_vm1, %v60_v8  ;;  %231 = vrot.lane.b32.xlu1 %v229_v9, %s408_s8 }
  0x30   :  { %297 = vmatprep.mubr.msk.f32.mxu1 %vm406_vm0, %v405_v0  ;;  %288 = vmatpush3.msra.mxu0 %v63_v3 }
  0x31   :  { %289 = vmatprep.subr.mxu0 %v405_v0 }
  0x32   :  { %290 = vmatpush3.msra.mxu0 %v62_v6 }
  0x33   :  { %298 = vmatmul.mubr.msk.f32.gmra.mxu1 %vm66_vm1, %v61_v10  ;;  %292 = vmatmul.mubr.msk.f32.vlgmr.msra.gmra.mxu0 %vm66_vm1, %v59_v11 }
  0x9c   :  { %v189_v12 = vpop.permute.xlu0 %188 }
  0x9d   :  { %v196_v13 = vpop.permute.xlu1 %195 }
  0xa0   :  { %v225_v17 = vpop.permute.xlu0 %224 }
  0xa1   :  { %v232_v19 = vpop.permute.xlu1 %231 }
  0xef   :  { %v147_v14 = vpop.f32.mrf.mxu1 }
  0xf0   :  { %v191_v15 = vadd.f32 %v189_v12, %v147_v14 }
  0xf1   :  { %v296_v16 = vpop.f32.mrf.mxu1 }
  0xf2   :  { %v198_v18 = vsub.f32 %v191_v15, %v196_v13 }
  0xf3   :  { %v152_v20 = vpop.f32.mrf.mxu1  ;;  %v142_v21 = vpop.f32.mrf.mxu0 }
  0xf4   :  { %v199_v22 = vmul.f32 %v198_v18, %v198_v18  ;;  %v227_v23 = vadd.f32 %v225_v17, %v152_v20  ;;  %v163_v29 = vadd.f32 %v271_v28, %v142_v21 }
  0xf5   :  { %v299_v24 = vpop.f32.mrf.mxu1  ;;  %v293_v25 = vpop.f32.mrf.mxu0 }
  0xf6   :  { %v234_v26 = vsub.f32 %v227_v23, %v232_v19  ;;  %201 = vrot.lane.b32.xlu0 %v199_v22, %s409_s9  ;;  %v165_v31 = vsub.f32 %v163_v29, %v164_v30 }
  0xf8   :  { %v235_v27 = vmul.f32 %v234_v26, %v234_v26  ;;  %v166_v32 = vmul.f32 %v165_v31, %v165_v31 }
  0xfa   :  { %237 = vrot.lane.b32.xlu1 %v235_v27, %s410_s10  ;;  %v168_v33 = vsel %vm167_vm2, %v166_v32, 0.0 }
 0x115   :  { %169 = vadd.xlane.f32.xlu0 %v168_v33 }
 0x168   :  { %v202_v34 = vpop.permute.xlu0 %201 }
 0x169   :  { %v204_v35 = vsel %vm167_vm2, %v202_v34, 0.0 }
 0x16a   :  { %205 = vadd.xlane.f32.xlu1 %v204_v35 }
 0x16c   :  { %v238_v36 = vpop.permute.xlu1 %237 }
 0x16d   :  { %v240_v37 = vsel %vm167_vm2, %v238_v36, 0.0 }
 0x16e   :  { %241 = vadd.xlane.f32.xlu0 %v240_v37 }
 0x19e   :  { %v170_v38 = vpop.xlane.xlu0 %169 }
 0x19f   :  { %v171_v39 = vrot.slane %v170_v38, 4 }
 0x1a1   :  { %v172_v40 = vadd.f32 %v171_v39, %v170_v38 }
 0x1a3   :  { %v173_v41 = vrot.slane %v172_v40, 2 }
 0x1a5   :  { %v174_v42 = vadd.f32 %v173_v41, %v172_v40 }
 0x1a7   :  { %v175_v43 = vrot.slane %v174_v42, 1 }
 0x1a9   :  { %v176_v44 = vadd.f32 %v175_v43, %v174_v42 }
 0x1ab   :  { %308 = vpush %v176_v44 }
 0x1dc   :  { %s309_s3 = spop %308 }
 0x1dd   :  { %s178_s13 = smul.f32 0.0078125, %s309_s3 }
 0x1df   :  { %180 = sst [smem:[#allocation8]] %s178_s13 }
 0x1f3   :  { %v206_v45 = vpop.xlane.xlu1 %205 }
 0x1f4   :  { %v207_v46 = vrot.slane %v206_v45, 4 }
 0x1f6   :  { %v208_v47 = vadd.f32 %v207_v46, %v206_v45 }
 0x1f7   :  { %v242_v48 = vpop.xlane.xlu0 %241 }
 0x1f8   :  { %v209_v49 = vrot.slane %v208_v47, 2  ;;  %v243_v50 = vrot.slane %v242_v48, 4 }
 0x1fa   :  { %v210_v51 = vadd.f32 %v209_v49, %v208_v47  ;;  %v244_v52 = vadd.f32 %v243_v50, %v242_v48 }
 0x1fc   :  { %v245_v53 = vrot.slane %v244_v52, 2  ;;  %v211_v54 = vrot.slane %v210_v51, 1 }
 0x1fe   :  { %v246_v55 = vadd.f32 %v245_v53, %v244_v52  ;;  %v212_v56 = vadd.f32 %v211_v54, %v210_v51 }
 0x200   :  { %310 = vpush %v212_v56  ;;  %v247_v57 = vrot.slane %v246_v55, 1 }
 0x202   :  { %v248_v58 = vadd.f32 %v247_v57, %v246_v55 }
 0x204   :  { %312 = vpush %v248_v58 }
 0x231   :  { %s311_s14 = spop %310 }
 0x232   :  { %s214_s15 = smul.f32 0.0078125, %s311_s14 }
 0x234   :  { %216 = sst [smem:[#allocation8 + $0x1]] %s214_s15 }
 0x235   :  { %s313_s16 = spop %312 }
 0x236   :  { %s250_s17 = smul.f32 0.0078125, %s313_s16 }
 0x238   :  { %252 = sst [smem:[#allocation8 + $0x2]] %s250_s17 }
 0x239   :  { %260 = dma.smem_to_hbm %s411_s18, 16, %s468_s4, [#allocation4]  }
 0x23a   :  { %398 = dma.done.wait [#allocation4], 16  }
 0x23b   :  { %399 = vsyncadd [#allocation4], 4294967280 }
 0x23c   :  { %264 = sfence }
 0x23d   :  { %265 = vsyncpa [#allocation3], 1 }
 0x23e   :  { %266 = vsyncpa [#allocation6], 1 }
 0x23f   :  { %267 = vsyncpa [#allocation4], 1 }

</bundles_post_ra>
